<compile_context>
chip_gen: v7x
topology: tpu7x:2x2x1
jax: 0.10.0
libtpu: 0.0.40
codegen_flags: <defaults>
</compile_context>

<pallas_src>
import math

import jax
import jax.numpy as jnp
from jax.experimental import pallas as pl
from jax.experimental.pallas import tpu as pltpu


def _round_up(x, m):
    return ((x + m - 1) // m) * m


def _cdiv(a, b):
    return (a + b - 1) // b


def _block_diag(w, g):
    """(k, m) -> (g*k, g*m): g copies of `w` on the block diagonal."""
    k, m = w.shape
    eye = jnp.eye(g, dtype=w.dtype)
    return (eye[:, None, :, None] * w[None, :, None, :]).reshape(g * k, g * m)


# ----------------------------------------------------------------------------
# Pallas kernel: fused 2-layer MLP on one lane-dense row tile.
# ----------------------------------------------------------------------------
def _vf_mlp_kernel(x_ref, t_ref, c_ref, w1_ref, wt_ref, w2_ref, b2_ref, out_ref):
    # Shapes (R = tile_rows, g elements per row, W = g*d_in, GH = g*H):
    #   x_ref:  (R, W)        f32   interleaved theta features, lane-dense
    #   t_ref:  (R, g)        f32   one time scalar per element
    #   c_ref:  (R, GH) or (1, GH) bf16  condition projection (+ b1)
    #   w1_ref: (W, GH)       bf16  block-diagonal W1x
    #   wt_ref: (g, GH)       bf16  block-diagonal w1t row
    #   w2_ref: (GH, W)       bf16  block-diagonal W2
    #   b2_ref: (1, W)        f32   tiled b2
    #   out_ref:(R, W)              lane-dense output
    xb = x_ref[...].astype(jnp.bfloat16)
    tb = t_ref[...].astype(jnp.bfloat16)
    # Layer 1: bf16 MXU matmuls, f32 accumulation (time term folded into MXU).
    h = jnp.dot(xb, w1_ref[...], preferred_element_type=jnp.float32)
    h = h + jnp.dot(tb, wt_ref[...], preferred_element_type=jnp.float32)
    h = h + c_ref[...].astype(jnp.float32)      # broadcasts over rows if B == 1
    h = jnp.maximum(h, 0.0)                     # ReLU on the VPU
    # Layer 2: bf16 operands (v5e MXU-friendly), f32 accumulation, lane-dense store.
    out = jnp.dot(h.astype(jnp.bfloat16), w2_ref[...],
                  preferred_element_type=jnp.float32)
    out_ref[...] = (out + b2_ref[...]).astype(out_ref.dtype)


def _vf_mlp_pallas(x2d, t2d, c_arg, w1_big, wt_big, w2_big, b2_big, *,
                   tile_rows, out_dtype):
    rows_pad, w_in = x2d.shape
    g = t2d.shape[1]
    g_h = w1_big.shape[1]
    c_is_const = (c_arg.shape[0] == 1)
    assert rows_pad % tile_rows == 0 and tile_rows % 8 == 0
    grid = (rows_pad // tile_rows,)

    row_spec = lambda width: pl.BlockSpec((tile_rows, width), lambda i: (i, 0))
    full_spec = lambda shape: pl.BlockSpec(shape, lambda i: tuple(0 for _ in shape))
    c_spec = full_spec(c_arg.shape) if c_is_const else row_spec(g_h)

    # Explicit VMEM budget: double-buffered streams + hidden temporaries +
    # resident weights + margin; capped at 48 MiB (v7x has 64 MiB per TC).
    lane = lambda w: _round_up(w, 128)
    stream_row = (lane(w_in) * 4 + lane(g) * 4 + lane(w_in) * 4
                  + (0 if c_is_const else lane(g_h) * 2))
    temp_row = lane(g_h) * (4 + 2) + lane(w_in) * 4        # h f32, h bf16, out f32
    weight_bytes = ((w1_big.size + wt_big.size + w2_big.size) * 2
                    + b2_big.size * 4 + (c_arg.size * 2 if c_is_const else 0))
    vmem_limit = (2 * tile_rows * stream_row + tile_rows * temp_row
                  + 2 * weight_bytes + (4 << 20))
    vmem_limit = int(min(max(vmem_limit, 16 << 20), 48 << 20))

    return pl.pallas_call(
        _vf_mlp_kernel,
        out_shape=jax.ShapeDtypeStruct((rows_pad, w_in), out_dtype),
        grid=grid,
        in_specs=[
            row_spec(w_in),              # x (interleaved theta)
            row_spec(g),                 # t
            c_spec,                      # condition projection
            full_spec(w1_big.shape),     # block-diag W1x (bf16)
            full_spec(wt_big.shape),     # block-diag w1t  (bf16)
            full_spec(w2_big.shape),     # block-diag W2   (bf16)
            full_spec(b2_big.shape),     # tiled b2        (f32)
        ],
        out_specs=row_spec(w_in),
        compiler_params=pltpu.CompilerParams(
            dimension_semantics=("parallel",),
            vmem_limit_bytes=vmem_limit),
    )(x2d, t2d, c_arg, w1_big, wt_big, w2_big, b2_big)


# ----------------------------------------------------------------------------
# JAX-side estimator mirroring ConditionalVectorFieldEstimator
# ----------------------------------------------------------------------------
class ConditionalVectorFieldEstimatorPallas:
    SCORE_DEFINED = True
    SDE_DEFINED = True
    MARGINALS_DEFINED = True

    def __init__(self, input_shape, condition_shape, hidden_dim=32,
                 t_min=0.0, t_max=1.0, mean_base=0.0, std_base=1.0,
                 seed=0, target_block_elems=32768, out_dtype=jnp.float32):
        self.input_shape = tuple(int(s) for s in input_shape)
        self.condition_shape = tuple(int(s) for s in condition_shape)
        self.t_min = float(t_min)
        self.t_max = float(t_max)
        self._out_dtype = out_dtype   # bf16 halves the dominant HBM write if OK
        # registered buffers of the PyTorch module
        self._mean_base = jnp.full((1, *self.input_shape), mean_base, jnp.float32)
        self._std_base = jnp.full((1, *self.input_shape), std_base, jnp.float32)

        d_in = 1
        for s in self.input_shape:
            d_in *= int(s)
        d_c = 1
        for s in self.condition_shape:
            d_c *= int(s)
        self._d_in, self._d_c, self._hidden = d_in, d_c, int(hidden_dim)
        # Smallest element-group g such that g*d_in is a multiple of 128 lanes.
        self._g = 128 // math.gcd(d_in, 128)
        self._target_rows = max(8, _round_up(int(target_block_elems) // self._g, 8))

        key = jax.random.PRNGKey(seed)
        k1, k2, k3, k4 = jax.random.split(key, 4)
        s1 = 1.0 / jnp.sqrt(jnp.float32(d_in))
        s2 = 1.0 / jnp.sqrt(jnp.float32(hidden_dim))
        self.params = {
            "w1x": jax.random.normal(k1, (d_in, hidden_dim), jnp.float32) * s1,
            "w1c": jax.random.normal(k2, (d_c, hidden_dim), jnp.float32) * s1,
            "w1t": jax.random.normal(k3, (1, hidden_dim), jnp.float32),
            "b1": jnp.zeros((1, hidden_dim), jnp.float32),
            "w2": jax.random.normal(k4, (hidden_dim, d_in), jnp.float32) * s2,
            "b2": jnp.zeros((1, d_in), jnp.float32),
        }
        # Kernel-layout weights, built once: g-fold block-diagonal bf16 copies
        # so the MXU evaluates the per-element MLP on the interleaved layout.
        g = self._g
        self._w1_big = _block_diag(self.params["w1x"].astype(jnp.bfloat16), g)
        self._wt_big = _block_diag(self.params["w1t"].astype(jnp.bfloat16), g)
        self._w2_big = _block_diag(self.params["w2"].astype(jnp.bfloat16), g)
        self._b2_big = jnp.tile(self.params["b2"], (1, g))            # (1, g*d_in) f32

    # ---- properties / shape checks of the base class -----------------------
    @property
    def mean_base(self):
        return self._mean_base

    @property
    def std_base(self):
        return self._std_base

    def _check_condition_shape(self, condition):
        exp = self.condition_shape
        if condition.ndim < len(exp) or tuple(condition.shape[-len(exp):]) != exp:
            raise ValueError(
                f"condition shape {condition.shape} incompatible with {exp}")

    def _check_input_shape(self, inp):
        exp = self.input_shape
        if inp.ndim < len(exp) or tuple(inp.shape[-len(exp):]) != exp:
            raise ValueError(f"input shape {inp.shape} incompatible with {exp}")

    # ---- forward pass -------------------------------------------------------
    def forward(self, input, condition, times):
        """input: (S, B, *input_shape); condition: (B, *cond_shape); times: (S, B)."""
        self._check_input_shape(input)
        self._check_condition_shape(condition)
        S, B = int(input.shape[0]), int(input.shape[1])
        d_in, d_c, H, g = self._d_in, self._d_c, self._hidden, self._g
        N = S * B
        w_in = g * d_in

        # Flattened (contiguity-preserving, i.e. free) views -- no transposes.
        x_flat = jnp.asarray(input, jnp.float32).reshape(N * d_in)
        t_flat = jnp.broadcast_to(jnp.asarray(times, jnp.float32), (S, B)).reshape(N)
        c2 = jnp.asarray(condition, jnp.float32).reshape(B, d_c)

        # Condition projection (+ b1) once per batch row; bf16 stream.
        c_pre = (jnp.dot(c2, self.params["w1c"],
                         precision=jax.lax.Precision.HIGHEST)
                 + self.params["b1"]).astype(jnp.bfloat16)             # (B, H)

        # --- choose the row tiling over the flattened element axis ----------
        rows8 = _round_up(max(_cdiv(N, g), 1), 8)
        lane = lambda w: _round_up(w, 128)
        stream_row = (lane(w_in) * 4 + lane(g) * 4 + lane(w_in) * 4
                      + (0 if B == 1 else lane(g * H) * 2))
        temp_row = lane(g * H) * (4 + 2) + lane(w_in) * 4
        per_row = 2 * stream_row + temp_row
        max_rows = max(8, ((40 << 20) // max(per_row, 1)) // 8 * 8)

        nt = max(1, _cdiv(rows8, self._target_rows))
        if nt == 1 and rows8 >= 16:
            nt = 2                                  # keep both v7x TCs busy
        tile_rows = _round_up(_cdiv(rows8, nt), 8)
        if tile_rows > max_rows:                    # respect the VMEM budget
            tile_rows = max_rows
            nt = _cdiv(rows8, tile_rows)
        rows_pad = nt * tile_rows
        n_pad = rows_pad * g - N

        if n_pad:
            x2d = jnp.pad(x_flat, (0, n_pad * d_in)).reshape(rows_pad, w_in)
            t2d = jnp.pad(t_flat, (0, n_pad)).reshape(rows_pad, g)
        else:
            x2d = x_flat.reshape(rows_pad, w_in)
            t2d = t_flat.reshape(rows_pad, g)

        if B == 1:
            # Single observation (common SBI sampling case): the condition term
            # is one resident (1, g*H) block, broadcast in-kernel.
            c_arg = jnp.tile(c_pre, (1, g))
        else:
            # General case: replicate the bf16 projection per element
            # (no replication cost when S == 1).
            c_rep = jnp.broadcast_to(c_pre[None], (S, B, H)).reshape(N, H)
            if n_pad:
                c_rep = jnp.pad(c_rep, ((0, n_pad), (0, 0)))
            c_arg = c_rep.reshape(rows_pad, g * H)

        out2d = _vf_mlp_pallas(x2d, t2d, c_arg,
                               self._w1_big, self._wt_big, self._w2_big,
                               self._b2_big, tile_rows=tile_rows,
                               out_dtype=self._out_dtype)

        out = out2d.reshape(rows_pad * w_in)
        if n_pad:
            out = out[: N * d_in]
        return out.reshape(S, B, *self.input_shape)

    def ode_fn(self, input, condition, times):
        return self.forward(input, condition, times)

    # Pure-JAX reference with the same dtype choices as the kernel.
    def _forward_ref(self, input, condition, times):
        S, B = int(input.shape[0]), int(input.shape[1])
        p = self.params
        x = jnp.asarray(input, jnp.float32).reshape(S * B, self._d_in)
        c = jnp.asarray(condition, jnp.float32).reshape(B, self._d_c)
        t = jnp.broadcast_to(jnp.asarray(times, jnp.float32),
                             (S, B)).reshape(S * B, 1)
        c_pre = (jnp.dot(c, p["w1c"], precision=jax.lax.Precision.HIGHEST)
                 + p["b1"]).astype(jnp.bfloat16).astype(jnp.float32)
        c_pre = jnp.broadcast_to(c_pre[None], (S, B, self._hidden)
                                 ).reshape(S * B, self._hidden)
        h = jnp.dot(x.astype(jnp.bfloat16), p["w1x"].astype(jnp.bfloat16),
                    preferred_element_type=jnp.float32)
        h = h + jnp.dot(t.astype(jnp.bfloat16), p["w1t"].astype(jnp.bfloat16),
                        preferred_element_type=jnp.float32)
        h = jnp.maximum(h + c_pre, 0.0)
        out = jnp.dot(h.astype(jnp.bfloat16), p["w2"].astype(jnp.bfloat16),
                      preferred_element_type=jnp.float32) + p["b2"]
        return out.reshape(S, B, *self.input_shape)

    # TODO(synk): loss / score / mean_t_fn / std_fn / drift_fn / diffusion_fn
    # are abstract or raise NotImplementedError in the base class; kept as-is.
    def loss(self, input, condition, **kwargs):
        raise NotImplementedError

    def score(self, input, condition, t):
        raise NotImplementedError("Score is not implemented for this estimator.")

    def mean_t_fn(self, times):
        raise NotImplementedError("Mean_t is not implemented for this estimator.")

    def std_fn(self, times):
        raise NotImplementedError("Std_t is not implemented for this estimator.")

    def drift_fn(self, input, times):
        raise NotImplementedError("Drift is not implemented for this estimator.")

    def diffusion_fn(self, input, times):
        raise NotImplementedError("Diffusion is not implemented for this estimator.")


if __name__ == "__main__":
    key = jax.random.PRNGKey(0)
    k1, k2, k3 = jax.random.split(key, 3)

    S, B = 2, 4             # sample_dim, batch_dim
    input_shape = (8,)      # event shape of theta
    condition_shape = (6,)  # event shape of x_o

    est = ConditionalVectorFieldEstimatorPallas(input_shape, condition_shape,
                                                hidden_dim=32, seed=0)

    theta_t = jax.random.normal(k1, (S, B, *input_shape), jnp.float32)
    x_o = jax.random.normal(k2, (B, *condition_shape), jnp.float32)
    times = jax.random.uniform(k3, (S, B), jnp.float32,
                               minval=est.t_min, maxval=est.t_max)

    # General (B > 1) path.
    vf = est.forward(theta_t, x_o, times)
    jax.block_until_ready(vf)
    assert vf.shape == (S, B, *input_shape)
    ref = est._forward_ref(theta_t, x_o, times)
    err = float(jnp.max(jnp.abs(vf - ref)))
    assert bool(jnp.allclose(vf, ref, atol=2e-2, rtol=2e-2)), f"max abs err {err}"

    # B == 1 (resident condition block) fast path.
    vf1 = est.forward(theta_t[:, :1], x_o[:1], times[:, :1])
    jax.block_until_ready(vf1)
    ref1 = est._forward_ref(theta_t[:, :1], x_o[:1], times[:, :1])
    err1 = float(jnp.max(jnp.abs(vf1 - ref1)))
    assert bool(jnp.allclose(vf1, ref1, atol=2e-2, rtol=2e-2)), f"max abs err {err1}"

    print("KERNEL_OK")
</pallas_src>

<mosaic_0001>
module attributes {stable_mosaic.version = 11 : i64} {
  func.func @_vf_mlp_kernel(%arg0: i32, %arg1: memref<8x128xf32, #tpu.memory_space<vmem>>, %arg2: memref<8x16xf32, #tpu.memory_space<vmem>>, %arg3: memref<8x512xbf16, #tpu.memory_space<vmem>>, %arg4: memref<128x512xbf16, #tpu.memory_space<vmem>>, %arg5: memref<16x512xbf16, #tpu.memory_space<vmem>>, %arg6: memref<512x128xbf16, #tpu.memory_space<vmem>>, %arg7: memref<1x128xf32, #tpu.memory_space<vmem>>, %arg8: memref<8x128xf32, #tpu.memory_space<vmem>>) attributes {dimension_semantics = [#tpu.dimension_semantics<parallel>], iteration_bounds = array<i64: 1>, scalar_prefetch = 0 : i64, scratch_operands = 0 : i64, tpu.core_type = #tpu.core_type<tc>, window_params = [{transform_indices = @transform_0, window_bounds = array<i64: 8, 128>}, {transform_indices = @transform_1, window_bounds = array<i64: 8, 16>}, {transform_indices = @transform_2, window_bounds = array<i64: 8, 512>}, {pipeline_mode = #tpu.pipeline_mode<synchronous>, transform_indices = @transform_3, window_bounds = array<i64: 128, 512>}, {pipeline_mode = #tpu.pipeline_mode<synchronous>, transform_indices = @transform_4, window_bounds = array<i64: 16, 512>}, {pipeline_mode = #tpu.pipeline_mode<synchronous>, transform_indices = @transform_5, window_bounds = array<i64: 512, 128>}, {pipeline_mode = #tpu.pipeline_mode<synchronous>, transform_indices = @transform_6, window_bounds = array<i64: 1, 128>}, {transform_indices = @transform_7, window_bounds = array<i64: 8, 128>}]} {
    %c0 = arith.constant 0 : index
    %c0_0 = arith.constant 0 : index
    %0 = vector.load %arg1[%c0, %c0_0] : memref<8x128xf32, #tpu.memory_space<vmem>>, vector<8x128xf32>
    %1 = arith.truncf %0 : vector<8x128xf32> to vector<8x128xbf16>
    %c0_1 = arith.constant 0 : index
    %c0_2 = arith.constant 0 : index
    %2 = vector.load %arg2[%c0_1, %c0_2] : memref<8x16xf32, #tpu.memory_space<vmem>>, vector<8x16xf32>
    %3 = arith.truncf %2 : vector<8x16xf32> to vector<8x16xbf16>
    %c0_3 = arith.constant 0 : index
    %c0_4 = arith.constant 0 : index
    %4 = vector.load %arg4[%c0_3, %c0_4] : memref<128x512xbf16, #tpu.memory_space<vmem>>, vector<128x512xbf16>
    %cst = arith.constant dense<0.000000e+00> : vector<8x512xf32>
    %5 = tpu.matmul %1, %4, %cst {dimension_numbers = #tpu.dot_dimension_numbers<[1], [0], [0], [1], [0, 0, 1, 1], [], []>} : vector<8x128xbf16>, vector<128x512xbf16>, vector<8x512xf32> -> vector<8x512xf32>
    %c0_5 = arith.constant 0 : index
    %c0_6 = arith.constant 0 : index
    %6 = vector.load %arg5[%c0_5, %c0_6] : memref<16x512xbf16, #tpu.memory_space<vmem>>, vector<16x512xbf16>
    %cst_7 = arith.constant dense<0.000000e+00> : vector<8x512xf32>
    %7 = tpu.matmul %3, %6, %cst_7 {dimension_numbers = #tpu.dot_dimension_numbers<[1], [0], [0], [1], [0, 0, 1, 1], [], []>} : vector<8x16xbf16>, vector<16x512xbf16>, vector<8x512xf32> -> vector<8x512xf32>
    %8 = arith.addf %5, %7 : vector<8x512xf32>
    %c0_8 = arith.constant 0 : index
    %c0_9 = arith.constant 0 : index
    %9 = vector.load %arg3[%c0_8, %c0_9] : memref<8x512xbf16, #tpu.memory_space<vmem>>, vector<8x512xbf16>
    %10 = arith.extf %9 : vector<8x512xbf16> to vector<8x512xf32>
    %11 = arith.addf %8, %10 : vector<8x512xf32>
    %cst_10 = arith.constant 0.000000e+00 : f32
    %12 = vector.broadcast %cst_10 : f32 to vector<8x512xf32>
    %13 = arith.maximumf %11, %12 : vector<8x512xf32>
    %14 = arith.truncf %13 : vector<8x512xf32> to vector<8x512xbf16>
    %c0_11 = arith.constant 0 : index
    %c0_12 = arith.constant 0 : index
    %15 = vector.load %arg6[%c0_11, %c0_12] : memref<512x128xbf16, #tpu.memory_space<vmem>>, vector<512x128xbf16>
    %cst_13 = arith.constant dense<0.000000e+00> : vector<8x128xf32>
    %16 = tpu.matmul %14, %15, %cst_13 {dimension_numbers = #tpu.dot_dimension_numbers<[1], [0], [0], [1], [0, 0, 1, 1], [], []>} : vector<8x512xbf16>, vector<512x128xbf16>, vector<8x128xf32> -> vector<8x128xf32>
    %c0_14 = arith.constant 0 : index
    %c0_15 = arith.constant 0 : index
    %17 = vector.load %arg7[%c0_14, %c0_15] : memref<1x128xf32, #tpu.memory_space<vmem>>, vector<1x128xf32>
    %18 = vector.broadcast %17 : vector<1x128xf32> to vector<8x128xf32>
    %19 = arith.addf %16, %18 : vector<8x128xf32>
    %c0_16 = arith.constant 0 : index
    %c0_17 = arith.constant 0 : index
    %20 = vector.load %arg8[%c0_16, %c0_17] : memref<8x128xf32, #tpu.memory_space<vmem>>, vector<8x128xf32>
    tpu.vector_store %arg8[%c0_16, %c0_17], %19 {strides = array<i32>} : memref<8x128xf32, #tpu.memory_space<vmem>>, vector<8x128xf32>,
    return
  }
  func.func @transform_0(%arg0: i32) -> (i32, i32) {
    %c0_i32 = arith.constant 0 : i32
    %c0_i32_0 = arith.constant 0 : i32
    return %arg0, %c0_i32 : i32, i32
  }
  func.func @transform_1(%arg0: i32) -> (i32, i32) {
    %c0_i32 = arith.constant 0 : i32
    %c0_i32_0 = arith.constant 0 : i32
    return %arg0, %c0_i32 : i32, i32
  }
  func.func @transform_2(%arg0: i32) -> (i32, i32) {
    %c0_i32 = arith.constant 0 : i32
    %c0_i32_0 = arith.constant 0 : i32
    return %arg0, %c0_i32 : i32, i32
  }
  func.func @transform_3(%arg0: i32) -> (i32, i32) {
    %c0_i32 = arith.constant 0 : i32
    %c0_i32_0 = arith.constant 0 : i32
    %c0_i32_1 = arith.constant 0 : i32
    return %c0_i32, %c0_i32_0 : i32, i32
  }
  func.func @transform_4(%arg0: i32) -> (i32, i32) {
    %c0_i32 = arith.constant 0 : i32
    %c0_i32_0 = arith.constant 0 : i32
    %c0_i32_1 = arith.constant 0 : i32
    return %c0_i32, %c0_i32_0 : i32, i32
  }
  func.func @transform_5(%arg0: i32) -> (i32, i32) {
    %c0_i32 = arith.constant 0 : i32
    %c0_i32_0 = arith.constant 0 : i32
    %c0_i32_1 = arith.constant 0 : i32
    return %c0_i32, %c0_i32_0 : i32, i32
  }
  func.func @transform_6(%arg0: i32) -> (i32, i32) {
    %c0_i32 = arith.constant 0 : i32
    %c0_i32_0 = arith.constant 0 : i32
    %c0_i32_1 = arith.constant 0 : i32
    return %c0_i32, %c0_i32_0 : i32, i32
  }
  func.func @transform_7(%arg0: i32) -> (i32, i32) {
    %c0_i32 = arith.constant 0 : i32
    %c0_i32_0 = arith.constant 0 : i32
    return %arg0, %c0_i32 : i32, i32
  }
}

</mosaic_0001>

<bundles_post_ra>
// kernel: tpu_custom_call.1
= control target key start
LH: loop header
LB: loop body
LE: loop exit
PB: predicated region body
PF: predicated region fallthrough
CT: control target
= control target key end

     0   :  { %12 = vsyncpa [#allocation3], 0  ;;  %s1408_s0 = inlined_call_operand.hbm [shape: f32[8,128], index: 0, kind: input, shape index: {}]   ;;  %s1409_s1 = inlined_call_operand.hbm [shape: f32[8,16], index: 1, kind: input, shape index: {}]   ;;  %s1410_s2 = inlined_call_operand.hbm [shape: bf16[8,512], index: 2, kind: input, shape index: {}]   ;;  %s1411_s3 = inlined_call_operand.hbm [shape: bf16[128,512], index: 3, kind: input, shape index: {}]   ;;  %s1412_s4 = inlined_call_operand.hbm [shape: bf16[16,512], index: 4, kind: input, shape index: {}]   ;;  %s1413_s5 = inlined_call_operand.hbm [shape: bf16[512,128], index: 5, kind: input, shape index: {}]   ;;  %s1414_s6 = inlined_call_operand.vmem [shape: f32[1,128], index: 6, kind: input, shape index: {}]   ;;  %s1415_s7 = inlined_call_operand.hbm [shape: f32[8,128], index: 7, kind: output, shape index: {}]  }
   0x1   :  { %13 = vsyncpa [#allocation6], 0 }
   0x2   :  { %14 = vsyncpa [#allocation9], 0 }
   0x3   :  { %15 = vsyncpa [#allocation12], 0 }
   0x4   :  { %16 = vsyncpa [#allocation4], 0  ;;  %s1249_s24 = smov [#allocation5]   ;;  %s1250_s26 = smov [#allocation8]  }
   0x5   :  { %s33_s25 = sshll.u32 %s1249_s24, 4  ;;  %s52_s27 = sshll.u32 %s1250_s26, 4  ;;  %s34_s25 = int_to_ptr.vmem [resolvable:$true] %s33_s25  ;;  %s1301_s27 = int_to_ptr.vmem [resolvable:$true] %s52_s27 }
   0x6   :  { %s1085_s30 = scalar_lea.hbm %s1409_s1, 128 }
   0x7   :  { %p1086_p0 = scmp.ne.s32.totalorder %s1409_s1, %s1085_s30  ;;  %p1089_p1 = scmp.lt.u32.totalorder %s1085_s30, %s1409_s1 }
   0x9   :  { %p1091_p2 = pnand %p1089_p1, %p1086_p0 }
   0xb   :  { %1094 = shalt.err (!%p1091_p2)
}
   0xc   :  { %s1095_s12 = scalar_lea.vmem %s34_s25, 128  ;;  %p1100_p4 = scmp.lt.s32.totalorder %s34_s25, %s34_s25 }
   0xd   :  { %p1096_p3 = scmp.ne.s32.totalorder %s34_s25, %s1095_s12  ;;  %p1101_p5 = scmp.lt.s32.totalorder %s1095_s12, %s1095_s12 }
   0xf   :  { %p1102_p6 = por %p1101_p5, %p1100_p4 }
  0x11   :  { %p1103_p7 = pnand %p1102_p6, %p1096_p3 }
  0x13   :  { %1106 = shalt.err (!%p1103_p7)
}
  0x14   :  { %36 = dma.hbm_to_vmem [thread:$0]  %s1409_s1, 128, %s34_s25, [#allocation6]  }
  0x15   :  { %s1107_s17 = scalar_lea.hbm %s1411_s3, 4096 }
  0x16   :  { %p1108_p8 = scmp.ne.s32.totalorder %s1411_s3, %s1107_s17  ;;  %p1111_p9 = scmp.lt.u32.totalorder %s1107_s17, %s1411_s3 }
  0x18   :  { %p1113_p10 = pnand %p1111_p9, %p1108_p8 }
  0x1a   :  { %1116 = shalt.err (!%p1113_p10)
}
  0x1b   :  { %s1117_s22 = scalar_lea.vmem %s1301_s27, 4096  ;;  %p1122_p12 = scmp.lt.s32.totalorder %s1301_s27, %s1301_s27 }
  0x1c   :  { %p1118_p11 = scmp.ne.s32.totalorder %s1301_s27, %s1117_s22  ;;  %p1123_p13 = scmp.lt.s32.totalorder %s1117_s22, %s1117_s22 }
  0x1e   :  { %p1124_p0 = por %p1123_p13, %p1122_p12 }
  0x20   :  { %p1125_p1 = pnand %p1124_p0, %p1118_p11 }
  0x22   :  { %1128 = shalt.err (!%p1125_p1)
}
  0x23   :  { %s1251_s1 = smov 256   ;;  %s1252_s23 = smov 16  }
  0x24   :  { %58 = dma.hbm_to_vmem [thread:$0]  %s1411_s3, 4096, %s1301_s27, [#allocation9], %s1251_s1, %s1251_s1, %s1252_s23  }
  0x25   :  { %s1253_s26 = smov [#allocation2]   ;;  %s1254_s29 = smov [#allocation7]  }
  0x26   :  { %s23_s28 = sshll.u32 %s1253_s26, 4  ;;  %s43_s30 = sshll.u32 %s1254_s29, 4  ;;  %s24_s28 = int_to_ptr.vmem [resolvable:$true] %s23_s28  ;;  %s44_s30 = int_to_ptr.vmem [resolvable:$true] %s43_s30 }
  0x27   :  { %s1129_s10 = scalar_lea.hbm %s1408_s0, 128 }
  0x28   :  { %p1130_p2 = scmp.ne.s32.totalorder %s1408_s0, %s1129_s10  ;;  %p1133_p3 = scmp.lt.u32.totalorder %s1129_s10, %s1408_s0 }
  0x2a   :  { %p1135_p4 = pnand %p1133_p3, %p1130_p2 }
  0x2c   :  { %1138 = shalt.err (!%p1135_p4)
}
  0x2d   :  { %s1139_s3 = scalar_lea.vmem %s24_s28, 128  ;;  %p1144_p6 = scmp.lt.s32.totalorder %s24_s28, %s24_s28 }
  0x2e   :  { %p1140_p5 = scmp.ne.s32.totalorder %s24_s28, %s1139_s3  ;;  %p1145_p7 = scmp.lt.s32.totalorder %s1139_s3, %s1139_s3 }
  0x30   :  { %p1146_p8 = por %p1145_p7, %p1144_p6 }
  0x32   :  { %p1147_p9 = pnand %p1146_p8, %p1140_p5 }
  0x34   :  { %1150 = shalt.err (!%p1147_p9)
}
  0x35   :  { %26 = dma.hbm_to_vmem [thread:$0]  %s1408_s0, 128, %s24_s28, [#allocation3]  }
  0x36   :  { %s1151_s18 = scalar_lea.hbm %s1410_s2, 256 }
  0x37   :  { %p1152_p10 = scmp.ne.s32.totalorder %s1410_s2, %s1151_s18  ;;  %p1155_p11 = scmp.lt.u32.totalorder %s1151_s18, %s1410_s2 }
  0x39   :  { %p1157_p12 = pnand %p1155_p11, %p1152_p10 }
  0x3b   :  { %1160 = shalt.err (!%p1157_p12)
}
  0x3c   :  { %s1161_s24 = scalar_lea.vmem %s44_s30, 256  ;;  %p1166_p0 = scmp.lt.s32.totalorder %s44_s30, %s44_s30 }
  0x3d   :  { %p1162_p13 = scmp.ne.s32.totalorder %s44_s30, %s1161_s24  ;;  %p1167_p1 = scmp.lt.s32.totalorder %s1161_s24, %s1161_s24 }
  0x3f   :  { %p1168_p2 = por %p1167_p1, %p1166_p0 }
  0x41   :  { %p1169_p3 = pnand %p1168_p2, %p1162_p13 }
  0x43   :  { %1172 = shalt.err (!%p1169_p3)
}
  0x44   :  { %46 = dma.hbm_to_vmem [thread:$0]  %s1410_s2, 256, %s44_s30, [#allocation6]  }
  0x45   :  { %s1255_s26 = smov [#allocation10]   ;;  %s1256_s29 = smov [#allocation11]  }
  0x46   :  { %s64_s28 = sshll.u32 %s1255_s26, 4  ;;  %s76_s8 = sshll.u32 %s1256_s29, 4  ;;  %s65_s28 = int_to_ptr.vmem [resolvable:$true] %s64_s28  ;;  %s1359_s8 = int_to_ptr.vmem [resolvable:$true] %s76_s8 }
  0x47   :  { %s1173_s11 = scalar_lea.hbm %s1412_s4, 512 }
  0x48   :  { %p1174_p4 = scmp.ne.s32.totalorder %s1412_s4, %s1173_s11  ;;  %p1177_p5 = scmp.lt.u32.totalorder %s1173_s11, %s1412_s4 }
  0x4a   :  { %p1179_p6 = pnand %p1177_p5, %p1174_p4 }
  0x4c   :  { %1182 = shalt.err (!%p1179_p6)
}
  0x4d   :  { %s1183_s2 = scalar_lea.vmem %s65_s28, 512  ;;  %p1188_p8 = scmp.lt.s32.totalorder %s65_s28, %s65_s28 }
  0x4e   :  { %p1184_p7 = scmp.ne.s32.totalorder %s65_s28, %s1183_s2  ;;  %p1189_p9 = scmp.lt.s32.totalorder %s1183_s2, %s1183_s2 }
  0x50   :  { %p1190_p10 = por %p1189_p9, %p1188_p8 }
  0x52   :  { %p1191_p11 = pnand %p1190_p10, %p1184_p7 }
  0x54   :  { %1194 = shalt.err (!%p1191_p11)
}
  0x55   :  { %70 = dma.hbm_to_vmem [thread:$0]  %s1412_s4, 512, %s65_s28, [#allocation9], %s1251_s1, %s1251_s1, %s1252_s23  }
  0x56   :  { %s1195_s17 = scalar_lea.hbm %s1413_s5, 4096 }
  0x57   :  { %p1196_p12 = scmp.ne.s32.totalorder %s1413_s5, %s1195_s17  ;;  %p1199_p13 = scmp.lt.u32.totalorder %s1195_s17, %s1413_s5 }
  0x59   :  { %p1201_p0 = pnand %p1199_p13, %p1196_p12 }
  0x5b   :  { %1204 = shalt.err (!%p1201_p0)
}
  0x5c   :  { %s1205_s22 = scalar_lea.vmem %s1359_s8, 4096  ;;  %p1210_p2 = scmp.lt.s32.totalorder %s1359_s8, %s1359_s8 }
  0x5d   :  { %p1206_p1 = scmp.ne.s32.totalorder %s1359_s8, %s1205_s22  ;;  %p1211_p3 = scmp.lt.s32.totalorder %s1205_s22, %s1205_s22 }
  0x5f   :  { %p1212_p4 = por %p1211_p3, %p1210_p2 }
  0x61   :  { %p1213_p5 = pnand %p1212_p4, %p1206_p1 }
  0x63   :  { %1216 = shalt.err (!%p1213_p5)
}
  0x64   :  { %s1257_s4 = smov 64   ;;  %s1258_s1 = smov 4  }
  0x65   :  { %82 = dma.hbm_to_vmem [thread:$0]  %s1413_s5, 4096, %s1359_s8, [#allocation12], %s1257_s4, %s1257_s4, %s1258_s1  }
  0x66   :  { %1239 = dma.done.wait [#allocation3], 128  }
  0x67   :  { %1240 = vsyncadd [#allocation3], 4294967168 }
  0x68   :  { %1241 = dma.done.wait [#allocation6], 384  }
  0x69   :  { %1242 = vsyncadd [#allocation6], 4294966912 }
  0x6a   :  { %1243 = dma.done.wait [#allocation9], 4608  }
  0x6b   :  { %1244 = vsyncadd [#allocation9], 4294962688 }
  0x6c   :  { %1245 = dma.done.wait [#allocation12], 4096  }
  0x6d   :  { %1246 = vsyncadd [#allocation12], 4294963200  ;;  %v1259_v0 = vmov 0   ;;  %v999_v1 = vld [vmem:[#allocation10 + $0x4] ss:$16 sps:$4 sm:$0xff]   ;;  %v106_v5 = vld [vmem:[#allocation5] sm:$0xff] }
  0x6e   :  { %200 = vmatprep.mubr.bf16.mxu0 %v1259_v0  ;;  %241 = vmatprep.mubr.bf16.mxu1 %v1259_v0  ;;  %v1001_v2 = vld [vmem:[#allocation10 + $0xc] ss:$16 sps:$4 sm:$0xff]   ;;  %v1003_v3 = vld [vmem:[#allocation10] ss:$16 sps:$4 sm:$0xff]   ;;  %v1004_v4 = vld [vmem:[#allocation10 + $0x8] ss:$16 sps:$4 sm:$0xff]   ;;  %v107_v6 = vpack.c.bf16 %v106_v5, %v106_v5 }
  0x6f   :  { %168 = vmatprep.subr.bf16.mxu0 %v999_v1  ;;  %209 = vmatprep.subr.bf16.mxu1 %v1001_v2  ;;  %v1005_v7 = vld [vmem:[#allocation8] ss:$16 sps:$4 sm:$0xff]   ;;  %vm164_vm0 = vcmask 130048   ;;  %v1007_v8 = vld [vmem:[#allocation8 + $0x4] ss:$16 sps:$4 sm:$0xff]   ;;  %v1057_v45 = vld [vmem:[#allocation11 + $0x48] sm:$0xff]  }
  0x70   :  { %169 = vmatpush1.bf16.msra.mxu0 %v1003_v3  ;;  %210 = vmatpush1.bf16.msra.mxu1 %v1004_v4  ;;  %v1008_v9 = vld [vmem:[#allocation8 + $0x8] ss:$16 sps:$4 sm:$0xff]   ;;  %v1010_v10 = vld [vmem:[#allocation8 + $0xc] ss:$16 sps:$4 sm:$0xff]   ;;  %v1013_v11 = vld [vmem:[#allocation8 + $0x24] ss:$16 sps:$4 sm:$0xff]  }
  0x71   :  { %410 = vmatprep.subr.bf16.mxu0 %v1007_v8  ;;  %v1011_v12 = vld [vmem:[#allocation8 + $0x20] ss:$16 sps:$4 sm:$0xff]   ;;  %451 = vmatprep.subr.bf16.mxu1 %v1010_v10  ;;  %v1016_v13 = vld [vmem:[#allocation8 + $0x2c] ss:$16 sps:$4 sm:$0xff]   ;;  %v1014_v14 = vld [vmem:[#allocation8 + $0x28] ss:$16 sps:$4 sm:$0xff]  }
  0x72   :  { %v1019_v15 = vld [vmem:[#allocation8 + $0x44] ss:$16 sps:$4 sm:$0xff]   ;;  %v1022_v16 = vld [vmem:[#allocation8 + $0x4c] ss:$16 sps:$4 sm:$0xff]   ;;  %v1017_v17 = vld [vmem:[#allocation8 + $0x40] ss:$16 sps:$4 sm:$0xff]  }
  0x73   :  { %876 = vmatmul.mubr.msk.bf16.vlgmr.msra.gmra.mrb[0].mxu0 %vm164_vm0, %v107_v6  ;;  %877 = vmatmul.mubr.msk.bf16.vlgmr.msra.gmra.mrb[0].mxu1 %vm164_vm0, %v107_v6  ;;  %v1020_v18 = vld [vmem:[#allocation8 + $0x48] ss:$16 sps:$4 sm:$0xff]   ;;  %v1025_v19 = vld [vmem:[#allocation8 + $0x64] ss:$16 sps:$4 sm:$0xff]   ;;  %v1028_v20 = vld [vmem:[#allocation8 + $0x6c] ss:$16 sps:$4 sm:$0xff]  }
  0x74   :  { %411 = vmatpush1.bf16.msra.mxu0 %v1005_v7  ;;  %452 = vmatpush1.bf16.msra.mxu1 %v1008_v9  ;;  %v1023_v21 = vld [vmem:[#allocation8 + $0x60] ss:$16 sps:$4 sm:$0xff]   ;;  %v1026_v22 = vld [vmem:[#allocation8 + $0x68] ss:$16 sps:$4 sm:$0xff]   ;;  %v1031_v23 = vld [vmem:[#allocation8 + $0x84] ss:$16 sps:$4 sm:$0xff]  }
  0x75   :  { %412 = vmatprep.subr.bf16.mxu0 %v1013_v11  ;;  %453 = vmatprep.subr.bf16.mxu1 %v1016_v13  ;;  %v1034_v24 = vld [vmem:[#allocation8 + $0x8c] ss:$16 sps:$4 sm:$0xff]   ;;  %v1029_v25 = vld [vmem:[#allocation8 + $0x80] ss:$16 sps:$4 sm:$0xff]   ;;  %v1032_v26 = vld [vmem:[#allocation8 + $0x88] ss:$16 sps:$4 sm:$0xff]  }
  0x76   :  { %442 = vmatprep.mubr.bf16.mxu0 %v1259_v0  ;;  %483 = vmatprep.mubr.bf16.mxu1 %v1259_v0  ;;  %v1037_v27 = vld [vmem:[#allocation8 + $0xa4] ss:$16 sps:$4 sm:$0xff]   ;;  %v1035_v28 = vld [vmem:[#allocation8 + $0xa0] ss:$16 sps:$4 sm:$0xff]   ;;  %v1040_v29 = vld [vmem:[#allocation8 + $0xac] ss:$16 sps:$4 sm:$0xff]  }
  0x77   :  { %v1038_v30 = vld [vmem:[#allocation8 + $0xa8] ss:$16 sps:$4 sm:$0xff]   ;;  %v1043_v31 = vld [vmem:[#allocation8 + $0xc4] ss:$16 sps:$4 sm:$0xff]   ;;  %v1046_v32 = vld [vmem:[#allocation8 + $0xcc] ss:$16 sps:$4 sm:$0xff]  }
  0x78   :  { %413 = vmatpush1.bf16.msra.mxu0 %v1011_v12  ;;  %454 = vmatpush1.bf16.msra.mxu1 %v1014_v14  ;;  %v1041_v33 = vld [vmem:[#allocation8 + $0xc0] ss:$16 sps:$4 sm:$0xff]   ;;  %v1044_v34 = vld [vmem:[#allocation8 + $0xc8] ss:$16 sps:$4 sm:$0xff]   ;;  %v1049_v35 = vld [vmem:[#allocation8 + $0xe4] ss:$16 sps:$4 sm:$0xff]  }
  0x79   :  { %414 = vmatprep.subr.bf16.mxu0 %v1019_v15  ;;  %455 = vmatprep.subr.bf16.mxu1 %v1022_v16  ;;  %v1052_v36 = vld [vmem:[#allocation8 + $0xec] ss:$16 sps:$4 sm:$0xff]   ;;  %v1047_v37 = vld [vmem:[#allocation8 + $0xe0] ss:$16 sps:$4 sm:$0xff]   ;;  %v1050_v39 = vld [vmem:[#allocation8 + $0xe8] ss:$16 sps:$4 sm:$0xff]  }
  0x7a   :  { %v104_v38 = vld [vmem:[#allocation2] sm:$0xff]  ;;  %v1058_v46 = vld [vmem:[#allocation11 + $0xc8] sm:$0xff]   ;;  %v1061_v49 = vld [vmem:[#allocation11 + $0x50] sm:$0xff]   ;;  %s1260_s25 = smov [#allocation13]  }
  0x7b   :  { %v105_v40 = vpack.c.bf16 %v104_v38, %v104_v38  ;;  %v1053_v41 = vld [vmem:[#allocation11 + $0x40] sm:$0xff]   ;;  %v1059_v47 = vld [vmem:[#allocation11 + $0x8] sm:$0xff]   ;;  %v1062_v50 = vld [vmem:[#allocation11 + $0xd0] sm:$0xff]   ;;  %s860_s26 = sshll.u32 %s1260_s25, 4  ;;  %s861_s26 = int_to_ptr.vmem [resolvable:$true] %s860_s26 }
  0x7c   :  { %415 = vmatpush1.bf16.msra.mxu0 %v1017_v17  ;;  %456 = vmatpush1.bf16.msra.mxu1 %v1020_v18  ;;  %v1054_v42 = vld [vmem:[#allocation11 + $0xc0] sm:$0xff]   ;;  %v1060_v48 = vld [vmem:[#allocation11 + $0x88] sm:$0xff]   ;;  %v1063_v51 = vld [vmem:[#allocation11 + $0x10] sm:$0xff]   ;;  %s1217_s28 = scalar_lea.vmem %s861_s26, 128  ;;  %p1222_p7 = scmp.lt.s32.totalorder %s861_s26, %s861_s26 }
  0x7d   :  { %416 = vmatprep.subr.bf16.mxu0 %v1025_v19  ;;  %457 = vmatprep.subr.bf16.mxu1 %v1028_v20  ;;  %v1055_v43 = vld [vmem:[#allocation11] sm:$0xff]   ;;  %v1064_v52 = vld [vmem:[#allocation11 + $0x90] sm:$0xff]   ;;  %v1065_v53 = vld [vmem:[#allocation11 + $0x58] sm:$0xff]   ;;  %p1218_p6 = scmp.ne.s32.totalorder %s861_s26, %s1217_s28  ;;  %p1223_p8 = scmp.lt.s32.totalorder %s1217_s28, %s1217_s28 }
  0x7e   :  { %v1056_v44 = vld [vmem:[#allocation11 + $0x80] sm:$0xff]   ;;  %v1066_v54 = vld [vmem:[#allocation11 + $0xd8] sm:$0xff]   ;;  %v1073_v61 = vld [vmem:[#allocation11 + $0x68] sm:$0xff]  }
  0x7f   :  { %v1067_v55 = vld [vmem:[#allocation11 + $0x18] sm:$0xff]   ;;  %v1069_v57 = vld [vmem:[#allocation11 + $0x60] sm:$0xff]   ;;  %v1074_v62 = vld [vmem:[#allocation11 + $0xe8] sm:$0xff]   ;;  %p1224_p9 = por %p1223_p8, %p1222_p7 }
  0x80   :  { %417 = vmatpush1.bf16.msra.mxu0 %v1023_v21  ;;  %458 = vmatpush1.bf16.msra.mxu1 %v1026_v22  ;;  %v1068_v56 = vld [vmem:[#allocation11 + $0x98] sm:$0xff]   ;;  %v1070_v58 = vld [vmem:[#allocation11 + $0xe0] sm:$0xff]   ;;  %v1075_v63 = vld [vmem:[#allocation11 + $0x28] sm:$0xff]  }
  0x81   :  { %418 = vmatprep.subr.bf16.mxu0 %v1031_v23  ;;  %459 = vmatprep.subr.bf16.mxu1 %v1034_v24  ;;  %v1071_v59 = vld [vmem:[#allocation11 + $0x20] sm:$0xff]   ;;  %v1076_v0 = vld [vmem:[#allocation11 + $0xa8] sm:$0xff]   ;;  %v1077_v1 = vld [vmem:[#allocation11 + $0x70] sm:$0xff]   ;;  %p1225_p10 = pnand %p1224_p9, %p1218_p6 }
  0x82   :  { %v1072_v60 = vld [vmem:[#allocation11 + $0xa0] sm:$0xff]   ;;  %v1078_v2 = vld [vmem:[#allocation11 + $0xf0] sm:$0xff]   ;;  %v1081_v5 = vld [vmem:[#allocation11 + $0x78] sm:$0xff]  }
  0x83   :  { %v1079_v3 = vld [vmem:[#allocation11 + $0x30] sm:$0xff]   ;;  %v1082_v6 = vld [vmem:[#allocation11 + $0xf8] sm:$0xff]  }
  0x84   :  { %419 = vmatpush1.bf16.msra.mxu0 %v1029_v25  ;;  %460 = vmatpush1.bf16.msra.mxu1 %v1032_v26  ;;  %v1080_v4 = vld [vmem:[#allocation11 + $0xb0] sm:$0xff]   ;;  %v1083_v7 = vld [vmem:[#allocation11 + $0x38] sm:$0xff]  }
  0x85   :  { %420 = vmatprep.subr.bf16.mxu0 %v1037_v27  ;;  %461 = vmatprep.subr.bf16.mxu1 %v1040_v29  ;;  %v1084_v8 = vld [vmem:[#allocation11 + $0xb8] sm:$0xff]   ;;  %v492_v17 = vld [vmem:[#allocation7] sm:$0xff] }
  0x86   :  { %v493_v18 = vld [vmem:[#allocation7 + $0x8] sm:$0xff]  ;;  %v494_v19 = vunpack.c.l.bf16 %v492_v17  ;;  %v495_v22 = vunpack.c.h.bf16 %v492_v17 }
  0x87   :  { %v496_v21 = vunpack.c.l.bf16 %v493_v18  ;;  %v497_v26 = vunpack.c.h.bf16 %v493_v18 }
  0x88   :  { %421 = vmatpush1.bf16.msra.mxu0 %v1035_v28  ;;  %462 = vmatpush1.bf16.msra.mxu1 %v1038_v30 }
  0x89   :  { %422 = vmatprep.subr.bf16.mxu0 %v1043_v31  ;;  %463 = vmatprep.subr.bf16.mxu1 %v1046_v32 }
  0x8c   :  { %423 = vmatpush1.bf16.msra.mxu0 %v1041_v33  ;;  %464 = vmatpush1.bf16.msra.mxu1 %v1044_v34 }
  0x8d   :  { %424 = vmatprep.subr.bf16.mxu0 %v1049_v35  ;;  %465 = vmatprep.subr.bf16.mxu1 %v1052_v36 }
  0x90   :  { %425 = vmatpush1.bf16.msra.mxu0 %v1047_v37  ;;  %466 = vmatpush1.bf16.msra.mxu1 %v1050_v39 }
  0x91   :  { %943 = vmatprep.subr.bf16.mxu0 %v1053_v41  ;;  %965 = vmatprep.subr.bf16.mxu1 %v1054_v42 }
  0x93   :  { %443 = vmatmul.mubr.bf16.vlgmr.msra.gmra.mrb[4].mxu0 %v105_v40  ;;  %484 = vmatmul.mubr.bf16.vlgmr.msra.gmra.mrb[4].mxu1 %v105_v40 }
  0x94   :  { %944 = vmatpush3.bf16.msra.mxu0 %v1055_v43  ;;  %966 = vmatpush3.bf16.msra.mxu1 %v1056_v44 }
  0x95   :  { %945 = vmatprep.subr.bf16.mxu0 %v1057_v45  ;;  %967 = vmatprep.subr.bf16.mxu1 %v1058_v46 }
  0x98   :  { %946 = vmatpush3.bf16.msra.mxu0 %v1059_v47  ;;  %968 = vmatpush3.bf16.msra.mxu1 %v1060_v48 }
  0x99   :  { %947 = vmatprep.subr.bf16.mxu0 %v1061_v49  ;;  %969 = vmatprep.subr.bf16.mxu1 %v1062_v50  ;;  %v910_v49 = vld [vmem:[%s1414_s6] ss:$0 sm:$0xff] }
  0x9c   :  { %948 = vmatpush3.bf16.msra.mxu0 %v1063_v51  ;;  %970 = vmatpush3.bf16.msra.mxu1 %v1064_v52 }
  0x9d   :  { %949 = vmatprep.subr.bf16.mxu0 %v1065_v53  ;;  %971 = vmatprep.subr.bf16.mxu1 %v1066_v54 }
  0xa0   :  { %950 = vmatpush3.bf16.msra.mxu0 %v1067_v55  ;;  %972 = vmatpush3.bf16.msra.mxu1 %v1068_v56 }
  0xa1   :  { %951 = vmatprep.subr.bf16.mxu0 %v1069_v57  ;;  %973 = vmatprep.subr.bf16.mxu1 %v1070_v58 }
  0xa4   :  { %952 = vmatpush3.bf16.msra.mxu0 %v1071_v59  ;;  %974 = vmatpush3.bf16.msra.mxu1 %v1072_v60 }
  0xa5   :  { %953 = vmatprep.subr.bf16.mxu0 %v1073_v61  ;;  %975 = vmatprep.subr.bf16.mxu1 %v1074_v62 }
  0xa8   :  { %954 = vmatpush3.bf16.msra.mxu0 %v1075_v63  ;;  %976 = vmatpush3.bf16.msra.mxu1 %v1076_v0 }
  0xa9   :  { %955 = vmatprep.subr.bf16.mxu0 %v1077_v1  ;;  %977 = vmatprep.subr.bf16.mxu1 %v1078_v2 }
  0xac   :  { %956 = vmatpush3.bf16.msra.mxu0 %v1079_v3  ;;  %978 = vmatpush3.bf16.msra.mxu1 %v1080_v4 }
  0xad   :  { %957 = vmatprep.subr.bf16.mxu0 %v1081_v5  ;;  %979 = vmatprep.subr.bf16.mxu1 %v1082_v6 }
  0xb0   :  { %958 = vmatpush3.bf16.msra.mxu0 %v1083_v7  ;;  %980 = vmatpush3.bf16.msra.mxu1 %v1084_v8 }
 0x146   :  { %v202_v9 = vpop.f32.mrb[0].mxu0  ;;  %v243_v10 = vpop.f32.mrb[0].mxu1 }
 0x147   :  { %v204_v11 = vpop.f32.mrb[1].mxu0  ;;  %v245_v12 = vpop.f32.mrb[1].mxu1 }
 0x148   :  { %v206_v13 = vpop.f32.mrb[2].mxu0  ;;  %v247_v14 = vpop.f32.mrb[2].mxu1 }
 0x149   :  { %v207_v15 = vpop.f32.mrb[3].mxu0  ;;  %v248_v16 = vpop.f32.mrb[3].mxu1 }
 0x166   :  { %v444_v20 = vpop.f32.mrb[4].mxu0  ;;  %v485_v24 = vpop.f32.mrb[4].mxu1 }
 0x167   :  { %v445_v23 = vadd.f32 %v444_v20, %v202_v9  ;;  %v446_v25 = vpop.f32.mrb[5].mxu0  ;;  %v486_v27 = vadd.f32 %v485_v24, %v243_v10  ;;  %v487_v29 = vpop.f32.mrb[5].mxu1 }
 0x168   :  { %v447_v28 = vadd.f32 %v446_v25, %v204_v11  ;;  %v448_v30 = vpop.f32.mrb[6].mxu0  ;;  %v488_v32 = vadd.f32 %v487_v29, %v245_v12  ;;  %v489_v33 = vpop.f32.mrb[6].mxu1 }
 0x169   :  { %v498_v31 = vadd.f32 %v494_v19, %v445_v23  ;;  %v449_v34 = vpop.f32.mrb[7].mxu0  ;;  %v500_v35 = vadd.f32 %v496_v21, %v486_v27  ;;  %v490_v37 = vpop.f32.mrb[7].mxu1 }
 0x16a   :  { %v499_v36 = vadd.f32 %v495_v22, %v447_v28  ;;  %v501_v39 = vadd.f32 %v497_v26, %v488_v32 }
 0x16b   :  { %v502_v38 = vmax.f32 %v498_v31, 0.0  ;;  %v504_v40 = vmax.f32 %v500_v35, 0.0 }
 0x16c   :  { %v503_v41 = vmax.f32 %v499_v36, 0.0  ;;  %v505_v42 = vmax.f32 %v501_v39, 0.0 }
 0x16d   :  { %v506_v44 = vpack.c.bf16 %v502_v38, %v502_v38  ;;  %v508_v46 = vpack.c.bf16 %v504_v40, %v504_v40 }
 0x16e   :  { %v507_v43 = vpack.c.bf16 %v503_v41, %v503_v41  ;;  %v509_v45 = vpack.c.bf16 %v505_v42, %v505_v42 }
 0x170   :  { %805 = vmatprep.mubr.bf16.mxu0 %v507_v43  ;;  %845 = vmatprep.mubr.bf16.mxu1 %v509_v45 }
 0x171   :  { %806 = vmatmul.mubr.bf16.vlgmr.msra.gmra.mrb[8].mxu0 %v506_v44  ;;  %846 = vmatmul.mubr.bf16.vlgmr.msra.gmra.mrb[8].mxu1 %v508_v46 }
 0x244   :  { %v959_v47 = vpop.f32.mrb[8].mxu0  ;;  %v981_v48 = vpop.f32.mrb[8].mxu1 }
 0x245   :  { %v960_v50 = vpop.f32.mrb[9].mxu0  ;;  %v982_v52 = vpop.f32.mrb[9].mxu1 }
 0x246   :  { %v961_v51 = vadd.f32 %v960_v50, %v959_v47  ;;  %v962_v53 = vpop.f32.mrb[10].mxu0  ;;  %v983_v54 = vadd.f32 %v982_v52, %v981_v48  ;;  %v984_v55 = vpop.f32.mrb[10].mxu1 }
 0x247   :  { %v963_v56 = vpop.f32.mrb[11].mxu0  ;;  %v985_v58 = vpop.f32.mrb[11].mxu1 }
 0x248   :  { %v808_v57 = vadd.f32 %v961_v51, %v910_v49 }
 0x24a   :  { %v848_v59 = vadd.f32 %v983_v54, %v808_v57 }
 0x24c   :  { %853 = vst [vmem:[#allocation13] sm:$0xff] %v848_v59 }
 0x24d   :  { %1228 = shalt.err (!%p1225_p10)
}
 0x24e   :  { %s1229_s8 = scalar_lea.hbm %s1415_s7, 128 }
 0x24f   :  { %p1230_p11 = scmp.ne.s32.totalorder %s1415_s7, %s1229_s8  ;;  %p1233_p12 = scmp.lt.u32.totalorder %s1229_s8, %s1415_s7 }
 0x251   :  { %p1235_p13 = pnand %p1233_p12, %p1230_p11 }
 0x253   :  { %1238 = shalt.err (!%p1235_p13)
}
 0x254   :  { %863 = dma.vmem_to_hbm [thread:$0]  %s861_s26, 128, %s1415_s7, [#allocation4]  }
 0x255   :  { %1247 = dma.done.wait [#allocation4], 128  }
 0x256   :  { %1248 = vsyncadd [#allocation4], 4294967168 }
 0x257   :  { %867 = vsyncpa [#allocation3], 1 }
 0x258   :  { %868 = vsyncpa [#allocation6], 1 }
 0x259   :  { %869 = vsyncpa [#allocation9], 1 }
 0x25a   :  { %870 = vsyncpa [#allocation12], 1 }
 0x25b   :  { %871 = vsyncpa [#allocation4], 1 }

</bundles_post_ra>
